<compile_context>
chip_gen: v7x
topology: tpu7x:2x2x1
jax: 0.10.0
libtpu: 0.0.40
codegen_flags: <defaults>
</compile_context>

<pallas_src>
import jax
import jax.numpy as jnp
from jax import lax
from jax.experimental import pallas as pl
from jax.experimental.pallas import tpu as pltpu
import numpy as np

EPS = 1e-5
_BF16_SUBLANE = 16  # sublane tile height for bf16 operands


def _make_res_enter_kernel(W, HW, Ntile, Cin_pad, inv_count):
    def kernel(xf_ref, w_ref, gamma_ref, beta_ref, mask_ref, o_ref,
               patches_ref, sum_ref, sumsq_ref, scale_ref, shift_ref):
        # xf_ref:    (Ntile, Cin_pad, L) bf16  row-flattened input (H padded by 1 row each
        #                                      side, flat axis padded by 1 each side,
        #                                      channels zero-padded to Cin_pad)
        # w_ref:     (Cout, 9*Cin_pad) bf16    packed conv weights (zero cols for pad chans)
        # gamma_ref/beta_ref: (Cout, 1) f32
        # mask_ref:  (2, HW) bf16              row0: zero where x==0, row1: zero where x==W-1
        # o_ref:     (Ntile, Cout, HW) f32     lane-dense output slab
        # patches_ref: VMEM (9*Cin_pad, Ntile*HW) bf16 im2col scratch
        # sum/sumsq/scale/shift: VMEM (Cout, 1) f32 persistent stats scratch
        phase = pl.program_id(0)   # 0 = conv + batch stats, 1 = normalize + write
        nb = pl.program_id(1)      # batch-tile index

        @pl.when(jnp.logical_and(phase == 0, nb == 0))
        def _init_stats():
            sum_ref[...] = jnp.zeros_like(sum_ref)
            sumsq_ref[...] = jnp.zeros_like(sumsq_ref)

        # Precomputed multiplicative horizontal-boundary masks (hoisted out of the loop).
        m_left = mask_ref[0:1, :]    # (1, HW)
        m_right = mask_ref[1:2, :]   # (1, HW)

        # Build the im2col patch matrix (9*Cin_pad, Ntile*HW) from 9 contiguous shifted
        # slabs per image.  Slices are taken directly on the input ref (no full-image
        # value materialization) and every store is a full sublane-aligned tile.
        for t in range(Ntile):
            lo = t * HW
            for ky in range(3):
                for kx in range(3):
                    off = ky * W + kx                           # static offset
                    slab = xf_ref[t, :, off:off + HW]           # (Cin_pad, HW) bf16
                    if kx == 0:
                        slab = slab * m_left
                    elif kx == 2:
                        slab = slab * m_right
                    r = (ky * 3 + kx) * Cin_pad
                    patches_ref[r:r + Cin_pad, lo:lo + HW] = slab

        # Single fused K = 9*Cin_pad bf16 MXU matmul, f32 accumulation.
        conv = jnp.dot(w_ref[...], patches_ref[...],
                       preferred_element_type=jnp.float32)      # (Cout, Ntile*HW) f32

        @pl.when(phase == 0)
        def _accumulate_stats():
            # TODO(synk): one-pass E[x^2]-E[x]^2 can cancel when |mean| >> std; switch to
            # a shifted / two-pass formulation for real activation statistics.
            sum_ref[...] += jnp.sum(conv, axis=1, keepdims=True)
            sumsq_ref[...] += jnp.sum(conv * conv, axis=1, keepdims=True)

        @pl.when(jnp.logical_and(phase == 1, nb == 0))
        def _finalize_stats():
            mean = sum_ref[...] * inv_count
            var = sumsq_ref[...] * inv_count - mean * mean
            scale = gamma_ref[...] * lax.rsqrt(var + EPS)
            scale_ref[...] = scale
            shift_ref[...] = beta_ref[...] - mean * scale

        @pl.when(phase == 1)
        def _normalize_and_store():
            y = conv * scale_ref[...] + shift_ref[...]          # (Cout, Ntile*HW) f32
            for t in range(Ntile):
                o_ref[t] = y[:, t * HW:(t + 1) * HW].astype(o_ref.dtype)

    return kernel


@jax.jit
def res_enter(x_nchw, w_oihw, gamma, beta):
    """x_nchw: (N, Cin, H, W) f32; w_oihw: (Cout, Cin, 3, 3) f32 -> (N, Cout, H, W) f32."""
    N, Cin, H, W = x_nchw.shape
    Cout = w_oihw.shape[0]
    HW = H * W
    L = (H + 2) * W + 2
    Cin_pad = ((Cin + _BF16_SUBLANE - 1) // _BF16_SUBLANE) * _BF16_SUBLANE

    # Fold several images into the lane axis per grid step (must divide N).
    target_lanes = 2048
    t_cap = max(1, min(N, target_lanes // HW))
    Ntile = 1
    for t in range(1, t_cap + 1):
        if N % t == 0:
            Ntile = t
    NB = N // Ntile

    # Stay in NCHW.  Zero-pad channels to the bf16 sublane tile, pad H by one zero row
    # top/bottom, flatten rows, pad the flat axis by one element each side so every 3x3
    # tap becomes a contiguous lane slab at a static offset.  Cast to bf16 (MXU-native).
    xc = jnp.pad(x_nchw, ((0, 0), (0, Cin_pad - Cin), (0, 0), (0, 0)))
    xh = jnp.pad(xc, ((0, 0), (0, 0), (1, 1), (0, 0)))
    xf = jnp.pad(xh.reshape(N, Cin_pad, (H + 2) * W),
                 ((0, 0), (0, 0), (1, 1))).astype(jnp.bfloat16)

    # Pack weights once: (Cout, Cin, 3, 3) -> (Cout, ky, kx, Cin_pad) -> (Cout, 9*Cin_pad).
    w_p = jnp.zeros((Cout, 3, 3, Cin_pad), dtype=jnp.float32)
    w_p = w_p.at[:, :, :, :Cin].set(jnp.transpose(w_oihw, (0, 2, 3, 1)))
    w_packed = w_p.reshape(Cout, 9 * Cin_pad).astype(jnp.bfloat16)

    gamma2 = gamma.reshape(Cout, 1).astype(jnp.float32)
    beta2 = beta.reshape(Cout, 1).astype(jnp.float32)

    # Horizontal-boundary multiplicative masks, computed once in the wrapper.
    col = jnp.arange(HW, dtype=jnp.int32) % W
    mask = jnp.stack([(col != 0), (col != (W - 1))]).astype(jnp.bfloat16)   # (2, HW)

    kernel = _make_res_enter_kernel(W, HW, Ntile, Cin_pad, 1.0 / float(N * H * W))

    # VMEM budget from actual block sizes (double-buffered in/out, scratch, f32 conv temp).
    bytes_needed = (
        2 * (Ntile * Cin_pad * L * 2)          # input blocks (bf16, double-buffered)
        + 2 * (Cout * 9 * Cin_pad * 2)         # packed weights
        + 2 * (2 * HW * 2 + 2 * Cout * 4)      # masks + gamma/beta
        + 2 * (Ntile * Cout * HW * 4)          # output blocks (f32, double-buffered)
        + (9 * Cin_pad) * (Ntile * HW) * 2     # im2col scratch (bf16)
        + 2 * Cout * (Ntile * HW) * 4          # f32 conv temporary + epilogue
        + 4 * Cout * 4                         # stats scratch
    )
    vmem_limit = int(min(128 * 1024 * 1024, max(32 * 1024 * 1024, 2 * bytes_needed)))

    out_flat = pl.pallas_call(
        kernel,
        out_shape=jax.ShapeDtypeStruct((N, Cout, HW), jnp.float32),
        grid_spec=pltpu.PrefetchScalarGridSpec(
            num_scalar_prefetch=0,
            grid=(2, NB),  # (phase, batch-tile); phase is the outer (slow) axis
            in_specs=[
                pl.BlockSpec((Ntile, Cin_pad, L), lambda p, n: (n, 0, 0)),
                pl.BlockSpec((Cout, 9 * Cin_pad), lambda p, n: (0, 0)),
                pl.BlockSpec((Cout, 1), lambda p, n: (0, 0)),
                pl.BlockSpec((Cout, 1), lambda p, n: (0, 0)),
                pl.BlockSpec((2, HW), lambda p, n: (0, 0)),
            ],
            # Phase 0 never writes the output: pin its block index at 0 so no writeback of
            # un-normalized data is observable; phase 1 fully overwrites each block.
            out_specs=pl.BlockSpec((Ntile, Cout, HW), lambda p, n: (n * p, 0, 0)),
            scratch_shapes=[
                pltpu.VMEM((9 * Cin_pad, Ntile * HW), jnp.bfloat16),  # im2col patches
                pltpu.VMEM((Cout, 1), jnp.float32),                   # sum
                pltpu.VMEM((Cout, 1), jnp.float32),                   # sum of squares
                pltpu.VMEM((Cout, 1), jnp.float32),                   # fused scale
                pltpu.VMEM((Cout, 1), jnp.float32),                   # fused shift
            ],
        ),
        compiler_params=pltpu.CompilerParams(
            # Both axes sequential: batch stats accumulate across all phase-0 steps and
            # phase-1 depends on the completed stats.
            dimension_semantics=("arbitrary", "arbitrary"),
            vmem_limit_bytes=vmem_limit,
        ),
    )(xf, w_packed, gamma2, beta2, mask)

    # Free reshape (merge of trailing dims): output is already NCHW-ordered.
    return out_flat.reshape(N, Cout, H, W)


def res_enter_ref(x_nchw, w_oihw, gamma, beta):
    """Pure-JAX reference matching PyTorch Conv2d(3x3,s1,p1,bias=False)+BatchNorm2d(train)."""
    conv = lax.conv_general_dilated(
        x_nchw, w_oihw, window_strides=(1, 1), padding=((1, 1), (1, 1)),
        dimension_numbers=("NCHW", "OIHW", "NCHW"))
    mean = jnp.mean(conv, axis=(0, 2, 3), keepdims=True)
    var = jnp.mean((conv - mean) ** 2, axis=(0, 2, 3), keepdims=True)
    g = gamma.reshape(1, -1, 1, 1)
    b = beta.reshape(1, -1, 1, 1)
    return (conv - mean) * lax.rsqrt(var + EPS) * g + b


if __name__ == "__main__":
    key = jax.random.PRNGKey(0)
    k_x, k_w, k_g, k_b = jax.random.split(key, 4)

    N, Cin, H, W = 2, 4, 16, 16
    Cout = 8

    x = jax.random.normal(k_x, (N, Cin, H, W), dtype=jnp.float32)
    fan_in = Cin * 3 * 3
    w = jax.random.normal(k_w, (Cout, Cin, 3, 3), dtype=jnp.float32) / np.sqrt(fan_in)
    gamma = 1.0 + 0.1 * jax.random.normal(k_g, (Cout,), dtype=jnp.float32)
    beta = 0.1 * jax.random.normal(k_b, (Cout,), dtype=jnp.float32)

    out = jax.block_until_ready(res_enter(x, w, gamma, beta))
    ref = jax.block_until_ready(res_enter_ref(x, w, gamma, beta))

    assert out.shape == (N, Cout, H, W)
    # Tolerance loosened vs. the f32 reference because MXU operands are bf16 (f32 accum).
    np.testing.assert_allclose(np.asarray(out), np.asarray(ref), rtol=5e-2, atol=5e-2)
    print("KERNEL_OK")
</pallas_src>

<mosaic_0001>
module attributes {stable_mosaic.version = 11 : i64} {
  func.func @kernel(%arg0: i32, %arg1: i32, %arg2: memref<2x16x290xbf16, #tpu.memory_space<vmem>>, %arg3: memref<8x144xbf16, #tpu.memory_space<vmem>>, %arg4: memref<8x1xf32, #tpu.memory_space<vmem>>, %arg5: memref<8x1xf32, #tpu.memory_space<vmem>>, %arg6: memref<2x256xbf16, #tpu.memory_space<vmem>>, %arg7: memref<2x8x256xf32, #tpu.memory_space<vmem>>, %arg8: memref<144x512xbf16, #tpu.memory_space<vmem>>, %arg9: memref<8x1xf32, #tpu.memory_space<vmem>>, %arg10: memref<8x1xf32, #tpu.memory_space<vmem>>, %arg11: memref<8x1xf32, #tpu.memory_space<vmem>>, %arg12: memref<8x1xf32, #tpu.memory_space<vmem>>) attributes {dimension_semantics = [#tpu.dimension_semantics<arbitrary>, #tpu.dimension_semantics<arbitrary>], iteration_bounds = array<i64: 2, 1>, scalar_prefetch = 0 : i64, scratch_operands = 5 : i64, tpu.core_type = #tpu.core_type<tc>, window_params = [{transform_indices = @transform_0, window_bounds = array<i64: 2, 16, 290>}, {pipeline_mode = #tpu.pipeline_mode<synchronous>, transform_indices = @transform_1, window_bounds = array<i64: 8, 144>}, {pipeline_mode = #tpu.pipeline_mode<synchronous>, transform_indices = @transform_2, window_bounds = array<i64: 8, 1>}, {pipeline_mode = #tpu.pipeline_mode<synchronous>, transform_indices = @transform_3, window_bounds = array<i64: 8, 1>}, {pipeline_mode = #tpu.pipeline_mode<synchronous>, transform_indices = @transform_4, window_bounds = array<i64: 2, 256>}, {transform_indices = @transform_5, window_bounds = array<i64: 2, 8, 256>}]} {
    %c0_i32 = arith.constant 0 : i32
    %0 = arith.cmpi eq, %arg0, %c0_i32 : i32
    %c0_i32_0 = arith.constant 0 : i32
    %1 = arith.cmpi eq, %arg1, %c0_i32_0 : i32
    %2 = arith.andi %0, %1 : i1
    %3 = arith.extui %2 : i1 to i32
    %c0_i32_1 = arith.constant 0 : i32
    %4 = arith.cmpi ne, %3, %c0_i32_1 : i32
    scf.if %4 {
      %cst_90 = arith.constant 0.000000e+00 : f32
      %99 = vector.broadcast %cst_90 : f32 to vector<8x1xf32>
      %c0_91 = arith.constant 0 : index
      %c0_92 = arith.constant 0 : index
      %100 = vector.load %arg9[%c0_91, %c0_92] : memref<8x1xf32, #tpu.memory_space<vmem>>, vector<8x1xf32>
      tpu.vector_store %arg9[%c0_91, %c0_92], %99 {strides = array<i32>} : memref<8x1xf32, #tpu.memory_space<vmem>>, vector<8x1xf32>,
      %cst_93 = arith.constant 0.000000e+00 : f32
      %101 = vector.broadcast %cst_93 : f32 to vector<8x1xf32>
      %c0_94 = arith.constant 0 : index
      %c0_95 = arith.constant 0 : index
      %102 = vector.load %arg10[%c0_94, %c0_95] : memref<8x1xf32, #tpu.memory_space<vmem>>, vector<8x1xf32>
      tpu.vector_store %arg10[%c0_94, %c0_95], %101 {strides = array<i32>} : memref<8x1xf32, #tpu.memory_space<vmem>>, vector<8x1xf32>,
    } else {
    }
    %c0 = arith.constant 0 : index
    %c0_2 = arith.constant 0 : index
    %5 = vector.load %arg6[%c0, %c0_2] : memref<2x256xbf16, #tpu.memory_space<vmem>>, vector<1x256xbf16>
    %c1 = arith.constant 1 : index
    %c0_3 = arith.constant 0 : index
    %6 = vector.load %arg6[%c1, %c0_3] : memref<2x256xbf16, #tpu.memory_space<vmem>>, vector<1x256xbf16>
    %c0_4 = arith.constant 0 : index
    %c0_5 = arith.constant 0 : index
    %c0_6 = arith.constant 0 : index
    %7 = vector.load %arg2[%c0_4, %c0_5, %c0_6] : memref<2x16x290xbf16, #tpu.memory_space<vmem>>, vector<1x16x256xbf16>
    %8 = vector.shape_cast %7 : vector<1x16x256xbf16> to vector<16x256xbf16>
    %9 = vector.broadcast %5 : vector<1x256xbf16> to vector<16x256xbf16>
    %10 = arith.mulf %8, %9 : vector<16x256xbf16>
    %c0_7 = arith.constant 0 : index
    %c0_8 = arith.constant 0 : index
    %11 = vector.load %arg8[%c0_7, %c0_8] : memref<144x512xbf16, #tpu.memory_space<vmem>>, vector<16x256xbf16>
    tpu.vector_store %arg8[%c0_7, %c0_8], %10 {strides = array<i32>} : memref<144x512xbf16, #tpu.memory_space<vmem>>, vector<16x256xbf16>,
    %c0_9 = arith.constant 0 : index
    %c0_10 = arith.constant 0 : index
    %c1_11 = arith.constant 1 : index
    %12 = vector.load %arg2[%c0_9, %c0_10, %c1_11] : memref<2x16x290xbf16, #tpu.memory_space<vmem>>, vector<1x16x256xbf16>
    %13 = vector.shape_cast %12 : vector<1x16x256xbf16> to vector<16x256xbf16>
    %c16 = arith.constant 16 : index
    %c0_12 = arith.constant 0 : index
    %14 = vector.load %arg8[%c16, %c0_12] : memref<144x512xbf16, #tpu.memory_space<vmem>>, vector<16x256xbf16>
    tpu.vector_store %arg8[%c16, %c0_12], %13 {strides = array<i32>} : memref<144x512xbf16, #tpu.memory_space<vmem>>, vector<16x256xbf16>,
    %c0_13 = arith.constant 0 : index
    %c0_14 = arith.constant 0 : index
    %c2 = arith.constant 2 : index
    %15 = vector.load %arg2[%c0_13, %c0_14, %c2] : memref<2x16x290xbf16, #tpu.memory_space<vmem>>, vector<1x16x256xbf16>
    %16 = vector.shape_cast %15 : vector<1x16x256xbf16> to vector<16x256xbf16>
    %17 = vector.broadcast %6 : vector<1x256xbf16> to vector<16x256xbf16>
    %18 = arith.mulf %16, %17 : vector<16x256xbf16>
    %c32 = arith.constant 32 : index
    %c0_15 = arith.constant 0 : index
    %19 = vector.load %arg8[%c32, %c0_15] : memref<144x512xbf16, #tpu.memory_space<vmem>>, vector<16x256xbf16>
    tpu.vector_store %arg8[%c32, %c0_15], %18 {strides = array<i32>} : memref<144x512xbf16, #tpu.memory_space<vmem>>, vector<16x256xbf16>,
    %c0_16 = arith.constant 0 : index
    %c0_17 = arith.constant 0 : index
    %c16_18 = arith.constant 16 : index
    %20 = vector.load %arg2[%c0_16, %c0_17, %c16_18] : memref<2x16x290xbf16, #tpu.memory_space<vmem>>, vector<1x16x256xbf16>
    %21 = vector.shape_cast %20 : vector<1x16x256xbf16> to vector<16x256xbf16>
    %22 = vector.broadcast %5 : vector<1x256xbf16> to vector<16x256xbf16>
    %23 = arith.mulf %21, %22 : vector<16x256xbf16>
    %c48 = arith.constant 48 : index
    %c0_19 = arith.constant 0 : index
    %24 = vector.load %arg8[%c48, %c0_19] : memref<144x512xbf16, #tpu.memory_space<vmem>>, vector<16x256xbf16>
    tpu.vector_store %arg8[%c48, %c0_19], %23 {strides = array<i32>} : memref<144x512xbf16, #tpu.memory_space<vmem>>, vector<16x256xbf16>,
    %c0_20 = arith.constant 0 : index
    %c0_21 = arith.constant 0 : index
    %c17 = arith.constant 17 : index
    %25 = vector.load %arg2[%c0_20, %c0_21, %c17] : memref<2x16x290xbf16, #tpu.memory_space<vmem>>, vector<1x16x256xbf16>
    %26 = vector.shape_cast %25 : vector<1x16x256xbf16> to vector<16x256xbf16>
    %c64 = arith.constant 64 : index
    %c0_22 = arith.constant 0 : index
    %27 = vector.load %arg8[%c64, %c0_22] : memref<144x512xbf16, #tpu.memory_space<vmem>>, vector<16x256xbf16>
    tpu.vector_store %arg8[%c64, %c0_22], %26 {strides = array<i32>} : memref<144x512xbf16, #tpu.memory_space<vmem>>, vector<16x256xbf16>,
    %c0_23 = arith.constant 0 : index
    %c0_24 = arith.constant 0 : index
    %c18 = arith.constant 18 : index
    %28 = vector.load %arg2[%c0_23, %c0_24, %c18] : memref<2x16x290xbf16, #tpu.memory_space<vmem>>, vector<1x16x256xbf16>
    %29 = vector.shape_cast %28 : vector<1x16x256xbf16> to vector<16x256xbf16>
    %30 = vector.broadcast %6 : vector<1x256xbf16> to vector<16x256xbf16>
    %31 = arith.mulf %29, %30 : vector<16x256xbf16>
    %c80 = arith.constant 80 : index
    %c0_25 = arith.constant 0 : index
    %32 = vector.load %arg8[%c80, %c0_25] : memref<144x512xbf16, #tpu.memory_space<vmem>>, vector<16x256xbf16>
    tpu.vector_store %arg8[%c80, %c0_25], %31 {strides = array<i32>} : memref<144x512xbf16, #tpu.memory_space<vmem>>, vector<16x256xbf16>,
    %c0_26 = arith.constant 0 : index
    %c0_27 = arith.constant 0 : index
    %c32_28 = arith.constant 32 : index
    %33 = vector.load %arg2[%c0_26, %c0_27, %c32_28] : memref<2x16x290xbf16, #tpu.memory_space<vmem>>, vector<1x16x256xbf16>
    %34 = vector.shape_cast %33 : vector<1x16x256xbf16> to vector<16x256xbf16>
    %35 = vector.broadcast %5 : vector<1x256xbf16> to vector<16x256xbf16>
    %36 = arith.mulf %34, %35 : vector<16x256xbf16>
    %c96 = arith.constant 96 : index
    %c0_29 = arith.constant 0 : index
    %37 = vector.load %arg8[%c96, %c0_29] : memref<144x512xbf16, #tpu.memory_space<vmem>>, vector<16x256xbf16>
    tpu.vector_store %arg8[%c96, %c0_29], %36 {strides = array<i32>} : memref<144x512xbf16, #tpu.memory_space<vmem>>, vector<16x256xbf16>,
    %c0_30 = arith.constant 0 : index
    %c0_31 = arith.constant 0 : index
    %c33 = arith.constant 33 : index
    %38 = vector.load %arg2[%c0_30, %c0_31, %c33] : memref<2x16x290xbf16, #tpu.memory_space<vmem>>, vector<1x16x256xbf16>
    %39 = vector.shape_cast %38 : vector<1x16x256xbf16> to vector<16x256xbf16>
    %c112 = arith.constant 112 : index
    %c0_32 = arith.constant 0 : index
    %40 = vector.load %arg8[%c112, %c0_32] : memref<144x512xbf16, #tpu.memory_space<vmem>>, vector<16x256xbf16>
    tpu.vector_store %arg8[%c112, %c0_32], %39 {strides = array<i32>} : memref<144x512xbf16, #tpu.memory_space<vmem>>, vector<16x256xbf16>,
    %c0_33 = arith.constant 0 : index
    %c0_34 = arith.constant 0 : index
    %c34 = arith.constant 34 : index
    %41 = vector.load %arg2[%c0_33, %c0_34, %c34] : memref<2x16x290xbf16, #tpu.memory_space<vmem>>, vector<1x16x256xbf16>
    %42 = vector.shape_cast %41 : vector<1x16x256xbf16> to vector<16x256xbf16>
    %43 = vector.broadcast %6 : vector<1x256xbf16> to vector<16x256xbf16>
    %44 = arith.mulf %42, %43 : vector<16x256xbf16>
    %c128 = arith.constant 128 : index
    %c0_35 = arith.constant 0 : index
    %45 = vector.load %arg8[%c128, %c0_35] : memref<144x512xbf16, #tpu.memory_space<vmem>>, vector<16x256xbf16>
    tpu.vector_store %arg8[%c128, %c0_35], %44 {strides = array<i32>} : memref<144x512xbf16, #tpu.memory_space<vmem>>, vector<16x256xbf16>,
    %c1_36 = arith.constant 1 : index
    %c0_37 = arith.constant 0 : index
    %c0_38 = arith.constant 0 : index
    %46 = vector.load %arg2[%c1_36, %c0_37, %c0_38] : memref<2x16x290xbf16, #tpu.memory_space<vmem>>, vector<1x16x256xbf16>
    %47 = vector.shape_cast %46 : vector<1x16x256xbf16> to vector<16x256xbf16>
    %48 = vector.broadcast %5 : vector<1x256xbf16> to vector<16x256xbf16>
    %49 = arith.mulf %47, %48 : vector<16x256xbf16>
    %c0_39 = arith.constant 0 : index
    %c256 = arith.constant 256 : index
    %50 = vector.load %arg8[%c0_39, %c256] : memref<144x512xbf16, #tpu.memory_space<vmem>>, vector<16x256xbf16>
    tpu.vector_store %arg8[%c0_39, %c256], %49 {strides = array<i32>} : memref<144x512xbf16, #tpu.memory_space<vmem>>, vector<16x256xbf16>,
    %c1_40 = arith.constant 1 : index
    %c0_41 = arith.constant 0 : index
    %c1_42 = arith.constant 1 : index
    %51 = vector.load %arg2[%c1_40, %c0_41, %c1_42] : memref<2x16x290xbf16, #tpu.memory_space<vmem>>, vector<1x16x256xbf16>
    %52 = vector.shape_cast %51 : vector<1x16x256xbf16> to vector<16x256xbf16>
    %c16_43 = arith.constant 16 : index
    %c256_44 = arith.constant 256 : index
    %53 = vector.load %arg8[%c16_43, %c256_44] : memref<144x512xbf16, #tpu.memory_space<vmem>>, vector<16x256xbf16>
    tpu.vector_store %arg8[%c16_43, %c256_44], %52 {strides = array<i32>} : memref<144x512xbf16, #tpu.memory_space<vmem>>, vector<16x256xbf16>,
    %c1_45 = arith.constant 1 : index
    %c0_46 = arith.constant 0 : index
    %c2_47 = arith.constant 2 : index
    %54 = vector.load %arg2[%c1_45, %c0_46, %c2_47] : memref<2x16x290xbf16, #tpu.memory_space<vmem>>, vector<1x16x256xbf16>
    %55 = vector.shape_cast %54 : vector<1x16x256xbf16> to vector<16x256xbf16>
    %56 = vector.broadcast %6 : vector<1x256xbf16> to vector<16x256xbf16>
    %57 = arith.mulf %55, %56 : vector<16x256xbf16>
    %c32_48 = arith.constant 32 : index
    %c256_49 = arith.constant 256 : index
    %58 = vector.load %arg8[%c32_48, %c256_49] : memref<144x512xbf16, #tpu.memory_space<vmem>>, vector<16x256xbf16>
    tpu.vector_store %arg8[%c32_48, %c256_49], %57 {strides = array<i32>} : memref<144x512xbf16, #tpu.memory_space<vmem>>, vector<16x256xbf16>,
    %c1_50 = arith.constant 1 : index
    %c0_51 = arith.constant 0 : index
    %c16_52 = arith.constant 16 : index
    %59 = vector.load %arg2[%c1_50, %c0_51, %c16_52] : memref<2x16x290xbf16, #tpu.memory_space<vmem>>, vector<1x16x256xbf16>
    %60 = vector.shape_cast %59 : vector<1x16x256xbf16> to vector<16x256xbf16>
    %61 = vector.broadcast %5 : vector<1x256xbf16> to vector<16x256xbf16>
    %62 = arith.mulf %60, %61 : vector<16x256xbf16>
    %c48_53 = arith.constant 48 : index
    %c256_54 = arith.constant 256 : index
    %63 = vector.load %arg8[%c48_53, %c256_54] : memref<144x512xbf16, #tpu.memory_space<vmem>>, vector<16x256xbf16>
    tpu.vector_store %arg8[%c48_53, %c256_54], %62 {strides = array<i32>} : memref<144x512xbf16, #tpu.memory_space<vmem>>, vector<16x256xbf16>,
    %c1_55 = arith.constant 1 : index
    %c0_56 = arith.constant 0 : index
    %c17_57 = arith.constant 17 : index
    %64 = vector.load %arg2[%c1_55, %c0_56, %c17_57] : memref<2x16x290xbf16, #tpu.memory_space<vmem>>, vector<1x16x256xbf16>
    %65 = vector.shape_cast %64 : vector<1x16x256xbf16> to vector<16x256xbf16>
    %c64_58 = arith.constant 64 : index
    %c256_59 = arith.constant 256 : index
    %66 = vector.load %arg8[%c64_58, %c256_59] : memref<144x512xbf16, #tpu.memory_space<vmem>>, vector<16x256xbf16>
    tpu.vector_store %arg8[%c64_58, %c256_59], %65 {strides = array<i32>} : memref<144x512xbf16, #tpu.memory_space<vmem>>, vector<16x256xbf16>,
    %c1_60 = arith.constant 1 : index
    %c0_61 = arith.constant 0 : index
    %c18_62 = arith.constant 18 : index
    %67 = vector.load %arg2[%c1_60, %c0_61, %c18_62] : memref<2x16x290xbf16, #tpu.memory_space<vmem>>, vector<1x16x256xbf16>
    %68 = vector.shape_cast %67 : vector<1x16x256xbf16> to vector<16x256xbf16>
    %69 = vector.broadcast %6 : vector<1x256xbf16> to vector<16x256xbf16>
    %70 = arith.mulf %68, %69 : vector<16x256xbf16>
    %c80_63 = arith.constant 80 : index
    %c256_64 = arith.constant 256 : index
    %71 = vector.load %arg8[%c80_63, %c256_64] : memref<144x512xbf16, #tpu.memory_space<vmem>>, vector<16x256xbf16>
    tpu.vector_store %arg8[%c80_63, %c256_64], %70 {strides = array<i32>} : memref<144x512xbf16, #tpu.memory_space<vmem>>, vector<16x256xbf16>,
    %c1_65 = arith.constant 1 : index
    %c0_66 = arith.constant 0 : index
    %c32_67 = arith.constant 32 : index
    %72 = vector.load %arg2[%c1_65, %c0_66, %c32_67] : memref<2x16x290xbf16, #tpu.memory_space<vmem>>, vector<1x16x256xbf16>
    %73 = vector.shape_cast %72 : vector<1x16x256xbf16> to vector<16x256xbf16>
    %74 = vector.broadcast %5 : vector<1x256xbf16> to vector<16x256xbf16>
    %75 = arith.mulf %73, %74 : vector<16x256xbf16>
    %c96_68 = arith.constant 96 : index
    %c256_69 = arith.constant 256 : index
    %76 = vector.load %arg8[%c96_68, %c256_69] : memref<144x512xbf16, #tpu.memory_space<vmem>>, vector<16x256xbf16>
    tpu.vector_store %arg8[%c96_68, %c256_69], %75 {strides = array<i32>} : memref<144x512xbf16, #tpu.memory_space<vmem>>, vector<16x256xbf16>,
    %c1_70 = arith.constant 1 : index
    %c0_71 = arith.constant 0 : index
    %c33_72 = arith.constant 33 : index
    %77 = vector.load %arg2[%c1_70, %c0_71, %c33_72] : memref<2x16x290xbf16, #tpu.memory_space<vmem>>, vector<1x16x256xbf16>
    %78 = vector.shape_cast %77 : vector<1x16x256xbf16> to vector<16x256xbf16>
    %c112_73 = arith.constant 112 : index
    %c256_74 = arith.constant 256 : index
    %79 = vector.load %arg8[%c112_73, %c256_74] : memref<144x512xbf16, #tpu.memory_space<vmem>>, vector<16x256xbf16>
    tpu.vector_store %arg8[%c112_73, %c256_74], %78 {strides = array<i32>} : memref<144x512xbf16, #tpu.memory_space<vmem>>, vector<16x256xbf16>,
    %c1_75 = arith.constant 1 : index
    %c0_76 = arith.constant 0 : index
    %c34_77 = arith.constant 34 : index
    %80 = vector.load %arg2[%c1_75, %c0_76, %c34_77] : memref<2x16x290xbf16, #tpu.memory_space<vmem>>, vector<1x16x256xbf16>
    %81 = vector.shape_cast %80 : vector<1x16x256xbf16> to vector<16x256xbf16>
    %82 = vector.broadcast %6 : vector<1x256xbf16> to vector<16x256xbf16>
    %83 = arith.mulf %81, %82 : vector<16x256xbf16>
    %c128_78 = arith.constant 128 : index
    %c256_79 = arith.constant 256 : index
    %84 = vector.load %arg8[%c128_78, %c256_79] : memref<144x512xbf16, #tpu.memory_space<vmem>>, vector<16x256xbf16>
    tpu.vector_store %arg8[%c128_78, %c256_79], %83 {strides = array<i32>} : memref<144x512xbf16, #tpu.memory_space<vmem>>, vector<16x256xbf16>,
    %c0_80 = arith.constant 0 : index
    %c0_81 = arith.constant 0 : index
    %85 = vector.load %arg3[%c0_80, %c0_81] : memref<8x144xbf16, #tpu.memory_space<vmem>>, vector<8x144xbf16>
    %c0_82 = arith.constant 0 : index
    %c0_83 = arith.constant 0 : index
    %86 = vector.load %arg8[%c0_82, %c0_83] : memref<144x512xbf16, #tpu.memory_space<vmem>>, vector<144x512xbf16>
    %cst = arith.constant dense<0.000000e+00> : vector<8x512xf32>
    %87 = tpu.matmul %85, %86, %cst {dimension_numbers = #tpu.dot_dimension_numbers<[1], [0], [0], [1], [0, 0, 1, 1], [], []>} : vector<8x144xbf16>, vector<144x512xbf16>, vector<8x512xf32> -> vector<8x512xf32>
    %c0_i32_84 = arith.constant 0 : i32
    %88 = arith.cmpi eq, %arg0, %c0_i32_84 : i32
    %89 = arith.extui %88 : i1 to i32
    %c0_i32_85 = arith.constant 0 : i32
    %90 = arith.cmpi ne, %89, %c0_i32_85 : i32
    scf.if %90 {
      %c0_90 = arith.constant 0 : index
      %c0_91 = arith.constant 0 : index
      %99 = vector.load %arg9[%c0_90, %c0_91] : memref<8x1xf32, #tpu.memory_space<vmem>>, vector<8x1xf32>
      %cst_92 = arith.constant dense<0.000000e+00> : vector<8xf32>
      %100 = vector.multi_reduction <add>, %87, %cst_92 [1] : vector<8x512xf32> to vector<8xf32>
      %101 = vector.shape_cast %100 : vector<8xf32> to vector<8x1xf32>
      %102 = arith.addf %99, %101 : vector<8x1xf32>
      %c0_93 = arith.constant 0 : index
      %c0_94 = arith.constant 0 : index
      %103 = vector.load %arg9[%c0_93, %c0_94] : memref<8x1xf32, #tpu.memory_space<vmem>>, vector<8x1xf32>
      tpu.vector_store %arg9[%c0_93, %c0_94], %102 {strides = array<i32>} : memref<8x1xf32, #tpu.memory_space<vmem>>, vector<8x1xf32>,
      %c0_95 = arith.constant 0 : index
      %c0_96 = arith.constant 0 : index
      %104 = vector.load %arg10[%c0_95, %c0_96] : memref<8x1xf32, #tpu.memory_space<vmem>>, vector<8x1xf32>
      %105 = arith.mulf %87, %87 : vector<8x512xf32>
      %cst_97 = arith.constant dense<0.000000e+00> : vector<8xf32>
      %106 = vector.multi_reduction <add>, %105, %cst_97 [1] : vector<8x512xf32> to vector<8xf32>
      %107 = vector.shape_cast %106 : vector<8xf32> to vector<8x1xf32>
      %108 = arith.addf %104, %107 : vector<8x1xf32>
      %c0_98 = arith.constant 0 : index
      %c0_99 = arith.constant 0 : index
      %109 = vector.load %arg10[%c0_98, %c0_99] : memref<8x1xf32, #tpu.memory_space<vmem>>, vector<8x1xf32>
      tpu.vector_store %arg10[%c0_98, %c0_99], %108 {strides = array<i32>} : memref<8x1xf32, #tpu.memory_space<vmem>>, vector<8x1xf32>,
    } else {
    }
    %c1_i32 = arith.constant 1 : i32
    %91 = arith.cmpi eq, %arg0, %c1_i32 : i32
    %c0_i32_86 = arith.constant 0 : i32
    %92 = arith.cmpi eq, %arg1, %c0_i32_86 : i32
    %93 = arith.andi %91, %92 : i1
    %94 = arith.extui %93 : i1 to i32
    %c0_i32_87 = arith.constant 0 : i32
    %95 = arith.cmpi ne, %94, %c0_i32_87 : i32
    scf.if %95 {
      %c0_90 = arith.constant 0 : index
      %c0_91 = arith.constant 0 : index
      %99 = vector.load %arg9[%c0_90, %c0_91] : memref<8x1xf32, #tpu.memory_space<vmem>>, vector<8x1xf32>
      %cst_92 = arith.constant 0.001953125 : f32
      %100 = vector.broadcast %cst_92 : f32 to vector<8x1xf32>
      %101 = arith.mulf %99, %100 : vector<8x1xf32>
      %c0_93 = arith.constant 0 : index
      %c0_94 = arith.constant 0 : index
      %102 = vector.load %arg10[%c0_93, %c0_94] : memref<8x1xf32, #tpu.memory_space<vmem>>, vector<8x1xf32>
      %cst_95 = arith.constant 0.001953125 : f32
      %103 = vector.broadcast %cst_95 : f32 to vector<8x1xf32>
      %104 = arith.mulf %102, %103 : vector<8x1xf32>
      %105 = arith.mulf %101, %101 : vector<8x1xf32>
      %106 = arith.subf %104, %105 : vector<8x1xf32>
      %c0_96 = arith.constant 0 : index
      %c0_97 = arith.constant 0 : index
      %107 = vector.load %arg4[%c0_96, %c0_97] : memref<8x1xf32, #tpu.memory_space<vmem>>, vector<8x1xf32>
      %cst_98 = arith.constant 9.99999974E-6 : f32
      %108 = vector.broadcast %cst_98 : f32 to vector<8x1xf32>
      %109 = arith.addf %106, %108 : vector<8x1xf32>
      %110 = math.rsqrt %109 : vector<8x1xf32>
      %111 = arith.mulf %107, %110 : vector<8x1xf32>
      %c0_99 = arith.constant 0 : index
      %c0_100 = arith.constant 0 : index
      %112 = vector.load %arg11[%c0_99, %c0_100] : memref<8x1xf32, #tpu.memory_space<vmem>>, vector<8x1xf32>
      tpu.vector_store %arg11[%c0_99, %c0_100], %111 {strides = array<i32>} : memref<8x1xf32, #tpu.memory_space<vmem>>, vector<8x1xf32>,
      %c0_101 = arith.constant 0 : index
      %c0_102 = arith.constant 0 : index
      %113 = vector.load %arg5[%c0_101, %c0_102] : memref<8x1xf32, #tpu.memory_space<vmem>>, vector<8x1xf32>
      %114 = arith.mulf %101, %111 : vector<8x1xf32>
      %115 = arith.subf %113, %114 : vector<8x1xf32>
      %c0_103 = arith.constant 0 : index
      %c0_104 = arith.constant 0 : index
      %116 = vector.load %arg12[%c0_103, %c0_104] : memref<8x1xf32, #tpu.memory_space<vmem>>, vector<8x1xf32>
      tpu.vector_store %arg12[%c0_103, %c0_104], %115 {strides = array<i32>} : memref<8x1xf32, #tpu.memory_space<vmem>>, vector<8x1xf32>,
    } else {
    }
    %c1_i32_88 = arith.constant 1 : i32
    %96 = arith.cmpi eq, %arg0, %c1_i32_88 : i32
    %97 = arith.extui %96 : i1 to i32
    %c0_i32_89 = arith.constant 0 : i32
    %98 = arith.cmpi ne, %97, %c0_i32_89 : i32
    scf.if %98 {
      %c0_90 = arith.constant 0 : index
      %c0_91 = arith.constant 0 : index
      %99 = vector.load %arg11[%c0_90, %c0_91] : memref<8x1xf32, #tpu.memory_space<vmem>>, vector<8x1xf32>
      %100 = vector.broadcast %99 : vector<8x1xf32> to vector<8x512xf32>
      %101 = arith.mulf %87, %100 : vector<8x512xf32>
      %c0_92 = arith.constant 0 : index
      %c0_93 = arith.constant 0 : index
      %102 = vector.load %arg12[%c0_92, %c0_93] : memref<8x1xf32, #tpu.memory_space<vmem>>, vector<8x1xf32>
      %103 = vector.broadcast %102 : vector<8x1xf32> to vector<8x512xf32>
      %104 = arith.addf %101, %103 : vector<8x512xf32>
      %105 = vector.extract_strided_slice %104 {offsets = [0, 0], sizes = [8, 256], strides = [1, 1]} : vector<8x512xf32> to vector<8x256xf32>
      %c0_94 = arith.constant 0 : index
      %c0_95 = arith.constant 0 : index
      %c0_96 = arith.constant 0 : index
      %106 = vector.load %arg7[%c0_94, %c0_95, %c0_96] : memref<2x8x256xf32, #tpu.memory_space<vmem>>, vector<1x8x256xf32>
      %107 = vector.shape_cast %106 : vector<1x8x256xf32> to vector<8x256xf32>
      %108 = vector.shape_cast %105 : vector<8x256xf32> to vector<1x8x256xf32>
      tpu.vector_store %arg7[%c0_94, %c0_95, %c0_96], %108 {strides = array<i32>} : memref<2x8x256xf32, #tpu.memory_space<vmem>>, vector<1x8x256xf32>,
      %109 = vector.extract_strided_slice %104 {offsets = [0, 256], sizes = [8, 256], strides = [1, 1]} : vector<8x512xf32> to vector<8x256xf32>
      %c1_97 = arith.constant 1 : index
      %c0_98 = arith.constant 0 : index
      %c0_99 = arith.constant 0 : index
      %110 = vector.load %arg7[%c1_97, %c0_98, %c0_99] : memref<2x8x256xf32, #tpu.memory_space<vmem>>, vector<1x8x256xf32>
      %111 = vector.shape_cast %110 : vector<1x8x256xf32> to vector<8x256xf32>
      %112 = vector.shape_cast %109 : vector<8x256xf32> to vector<1x8x256xf32>
      tpu.vector_store %arg7[%c1_97, %c0_98, %c0_99], %112 {strides = array<i32>} : memref<2x8x256xf32, #tpu.memory_space<vmem>>, vector<1x8x256xf32>,
    } else {
    }
    return
  }
  func.func @transform_0(%arg0: i32, %arg1: i32) -> (i32, i32, i32) {
    %c0_i32 = arith.constant 0 : i32
    %c0_i32_0 = arith.constant 0 : i32
    %c0_i32_1 = arith.constant 0 : i32
    return %arg1, %c0_i32, %c0_i32_0 : i32, i32, i32
  }
  func.func @transform_1(%arg0: i32, %arg1: i32) -> (i32, i32) {
    %c0_i32 = arith.constant 0 : i32
    %c0_i32_0 = arith.constant 0 : i32
    %c0_i32_1 = arith.constant 0 : i32
    return %c0_i32, %c0_i32_0 : i32, i32
  }
  func.func @transform_2(%arg0: i32, %arg1: i32) -> (i32, i32) {
    %c0_i32 = arith.constant 0 : i32
    %c0_i32_0 = arith.constant 0 : i32
    %c0_i32_1 = arith.constant 0 : i32
    return %c0_i32, %c0_i32_0 : i32, i32
  }
  func.func @transform_3(%arg0: i32, %arg1: i32) -> (i32, i32) {
    %c0_i32 = arith.constant 0 : i32
    %c0_i32_0 = arith.constant 0 : i32
    %c0_i32_1 = arith.constant 0 : i32
    return %c0_i32, %c0_i32_0 : i32, i32
  }
  func.func @transform_4(%arg0: i32, %arg1: i32) -> (i32, i32) {
    %c0_i32 = arith.constant 0 : i32
    %c0_i32_0 = arith.constant 0 : i32
    %c0_i32_1 = arith.constant 0 : i32
    return %c0_i32, %c0_i32_0 : i32, i32
  }
  func.func @transform_5(%arg0: i32, %arg1: i32) -> (i32, i32, i32) {
    %0 = arith.muli %arg1, %arg0 : i32
    %c0_i32 = arith.constant 0 : i32
    %c0_i32_0 = arith.constant 0 : i32
    %c0_i32_1 = arith.constant 0 : i32
    return %0, %c0_i32, %c0_i32_0 : i32, i32, i32
  }
}

</mosaic_0001>

<bundles_post_ra>
// kernel: res_enter.1
= control target key start
LH: loop header
LB: loop body
LE: loop exit
PB: predicated region body
PF: predicated region fallthrough
CT: control target
= control target key end

     0   :  { %s1413_s18 = smov 0   ;;  %s1415_s19 = smov 0   ;;  %s1720_s0 = inlined_call_operand.vmem [shape: bf16[2,16,290], index: 0, kind: input, shape index: {}]   ;;  %s1721_s1 = inlined_call_operand.vmem [shape: bf16[8,144], index: 1, kind: input, shape index: {}]   ;;  %s1722_s2 = inlined_call_operand.vmem [shape: f32[8,1], index: 2, kind: input, shape index: {}]   ;;  %s1723_s3 = inlined_call_operand.vmem [shape: f32[8,1], index: 3, kind: input, shape index: {}]   ;;  %s1724_s4 = inlined_call_operand.vmem [shape: bf16[2,256], index: 4, kind: input, shape index: {}]   ;;  %s1725_s5 = inlined_call_operand.vmem [shape: f32[2,8,256], index: 5, kind: output, shape index: {}]  }
   0x1   :  { %s1417_s20 = smov 0  }
   0x2 LB: > { %s27_s21 = sadd.s32 1, %s1361_s19  ;;  %p1182_p0 = scmp.ge.s32.totalorder %s1365_s20, 1  ;;  %s1365_s20 = sphi %s1417_s20, %s15_s20   ;;  %s1361_s19 = sphi %s1415_s19, %s1727_s19   ;;  %s1357_s18 = sphi %s1413_s18, %s1726_s18  }
   0x3   : > { %p29_p1 = scmp.ge.s32.totalorder %s27_s21, 2  ;;  %p203_p2 = scmp.lt.s32.totalorder %s1365_s20, 3 }
   0x5   : > { %s1729_s21 = smov (%p29_p1, %s27_s21), 0  ;;  %p204_p3 = pnand %p1182_p0, %p203_p2 }
   0x6   : > { %p251_p4 = scmp.eq.s32.totalorder (!%p204_p3), %s1357_s18, 0 }
   0x7   : > { %207 = sbr.rel (%p204_p3) target bundleno = 876 (0x36c), region = 40 }
   0xe   : > { %256 = sbr.rel (!%p251_p4) target bundleno = 21 (0x15), region = 44  ;;  %vm257_vm0 = vcmask (%p251_p4), 7168   ;;  %v1367_v0 = vmov (%p251_p4), 0.0  }
   0xf   : > { %258 = vst.msk [vmem:[#allocation3] sm:$0xff] (%p251_p4), %vm257_vm0, %v1367_v0  ;;  %259 = vst.msk [vmem:[#allocation4] sm:$0xff] (%p251_p4), %vm257_vm0, %v1367_v0 }
  0x15 PF: > { %v1328_v1 = vld [vmem:[%s1720_s0 + $0x8] ss:$12 sps:$4 sm:$0xff]   ;;  %v1440_v2 = vld [vmem:[%s1720_s0] sm:$0xff]  ;;  %v1445_v3 = vld [vmem:[%s1720_s0 + $0xc] sm:$0xff]  ;;  %v275_v4 = vlaneseq  ;;  %s1368_s28 = smov 127   ;;  %s1370_s12 = smov 32  }
  0x16   : > { %341 = vrot.lane.b32.xlu0 %v1328_v1, %s1368_s28  ;;  %v1450_v5 = vcombine.high %v1440_v2, %v1445_v3  ;;  %v1331_v6 = vld [vmem:[%s1720_s0 + $0x20] ss:$12 sps:$4 sm:$0xff]   ;;  %v1458_v7 = vld [vmem:[%s1720_s0 + $0x18] sm:$0xff]  ;;  %v1463_v8 = vld [vmem:[%s1720_s0 + $0x24] sm:$0xff]  ;;  %v1369_v11 = vmov 1966171168   ;;  %v1479_v31 = vcombine.low %v1440_v2, %v1445_v3 }
  0x17   : > { %v1469_v9 = vcombine.high %v1458_v7, %v1463_v8  ;;  %v1184_v10 = vld.sshfl [vmem:[%s1724_s4] sm:$0x11 pattern:$0x75316420]  ;;  %v273_v12 = vunpack.c.l.s4 %v1369_v11  ;;  %v276_v13 = vshrl.u32 %v275_v4, 7  ;;  %s1371_s13 = smov 16   ;;  %v1489_v41 = vcombine.low %v1458_v7, %v1463_v8 }
  0x18   : > { %339 = vrot.lane.b32.xlu1 %v1450_v5, %s1368_s28  ;;  %v271_v14 = vcombine.high %v1184_v10, %v1184_v10  ;;  %s1372_s14 = smov 2   ;;  %s1373_s15 = smov 34   ;;  %v1334_v42 = vld [vmem:[%s1720_s0 + $0x8] ss:$12 sps:$4 sm:$0xff]   ;;  %v1335_v43 = vld [vmem:[%s1720_s0 + $0x20] ss:$12 sps:$4 sm:$0xff]  }
  0x19   : > { %v274_v15 = vunpack.c.0.s8 %v273_v12  ;;  %v291_v19 = vsub.s32 0, %v276_v13  ;;  %s1374_s16 = smov 18   ;;  %s1375_s17 = smov 111   ;;  %v1336_v44 = vld [vmem:[%s1720_s0 + $0x8] ss:$12 sps:$4 sm:$0xff]   ;;  %vm343_vm1 = vcmask 1039360  }
  0x1a   : > { %672 = vrot.lane.b32.xlu0 %v1331_v6, %s1368_s28  ;;  %s1376_s26 = smov 95   ;;  %vm417_vm2 = vcmask 130048   ;;  %v411_v53 = vld [vmem:[%s1720_s0 + $0x8] sm:$0xf]  ;;  %v413_v54 = vld [vmem:[%s1720_s0 + $0x14] sm:$0xf] }
  0x1b   : > { %v277_v16 = vsub.s32 %v274_v15, %v276_v13  ;;  %v1232_v59 = vld [vmem:[%s1720_s0 + $0x20] sm:$0xf]  ;;  %v1234_v62 = vld [vmem:[%s1720_s0 + $0x2c] sm:$0xf]  ;;  %v523_v1 = vld [vmem:[%s1720_s0 + $0x8] sm:$0xf] }
  0x1c   : > { %670 = vrot.lane.b32.xlu1 %v1469_v9, %s1368_s28  ;;  %v525_v4 = vld [vmem:[%s1720_s0 + $0x14] sm:$0xf]  ;;  %vm529_vm3 = vcmask 261120   ;;  %s1378_s25 = smov 96   ;;  %vm376_vm4 = vcmask 15360   ;;  %vm488_vm5 = vcmask 146432  }
  0x1d   : > { %v278_v17 = vrot.slane %v1184_v10, %v277_v16  ;;  %v285_v18 = vrot.slane %v271_v14, %v277_v16  ;;  %s1380_s23 = smov 110   ;;  %vm600_vm6 = vcmask 277504   ;;  %s1381_s11 = smov 94   ;;  %vm403_vm7 = vcmask 1031168  }
  0x1e   : > { %vm444_vm8 = vcmask 916480   ;;  %vm474_vm9 = vcmask 908288   ;;  %vm515_vm10 = vcmask 900096   ;;  %vm556_vm11 = vcmask 785408   ;;  %p1277_p5 = scmp.ne.s32.totalorder %s1357_s18, 0 }
  0x1f   : > { %v287_v20 = vpack.i.b16 %v278_v17, %v278_v17  ;;  %v294_v21 = vpack.i.b16 %v285_v18, %v285_v18  ;;  %v354_v22 = vshrl.u32 %v278_v17, 16  ;;  %v361_v23 = vshrl.u32 %v285_v18, 16 }
  0x20   : > { %vm586_vm12 = vcmask 777216   ;;  %vm627_vm13 = vcmask 769024   ;;  %vm1042_vm14 = vcmask (!%p1277_p5), 7168  }
  0x21   : > { %v292_v24 = vrot.slane %v287_v20, %v291_v19  ;;  %v299_v25 = vrot.slane %v294_v21, %v291_v19  ;;  %v355_v26 = vpack.i.b16 %v354_v22, %v354_v22  ;;  %v362_v27 = vpack.i.b16 %v361_v23, %v361_v23  ;;  %v1253_v20 = vld [vmem:[%s1720_s0 + $0x20] sm:$0xf]  ;;  %v1255_v21 = vld [vmem:[%s1720_s0 + $0x2c] sm:$0xf] }
  0x23   : > { %v1185_v28 = vcombine.low %v292_v24, %v299_v25  ;;  %v360_v29 = vrot.slane %v355_v26, %v291_v19  ;;  %v367_v30 = vrot.slane %v362_v27, %v291_v19 }
  0x25   : > { %526 = vrot.lane.b32.xlu1 %v1185_v28, %s1370_s12  ;;  %414 = vrot.lane.b32.xlu0 %v1185_v28, %s1371_s13  ;;  %v1191_v32 = vcombine.low %v360_v29, %v367_v30  ;;  %v306_v33 = vmul.bf16 %v1185_v28, %v1440_v2  ;;  %v307_v34 = vmul.bf16 %v1185_v28, %v1445_v3 }
  0x26   : > { %v637_v35 = vmul.bf16 %v1458_v7, %v1185_v28  ;;  %v638_v36 = vmul.bf16 %v1463_v8, %v1185_v28 }
  0x27   : > { %v1187_v37 = vcombine.high %v306_v33, %v307_v34  ;;  %v1186_v38 = vcombine.low %v306_v33, %v307_v34 }
  0x28   : > { %v1216_v39 = vcombine.high %v637_v35, %v638_v36  ;;  %v1215_v40 = vcombine.low %v637_v35, %v638_v36 }
  0x29   : > { %337 = vrot.lane.b32.xlu1 %v1479_v31, %s1368_s28  ;;  %373 = vrot.lane.b32.xlu0 %v1191_v32, %s1372_s14  ;;  %s1379_s14 = smov 126  }
  0x2a   : > { %950 = vmatprep.subr.bf16.mxu0 %v1187_v37  ;;  %991 = vmatprep.subr.bf16.mxu1 %v1216_v39  ;;  %v351_v37 = vld [vmem:[%s1720_s0 + $0x8] sm:$0xf] }
  0x2b   : > { %951 = vmatpush1.bf16.msra.mxu0 %v1186_v38  ;;  %992 = vmatpush1.bf16.msra.mxu1 %v1215_v40  ;;  %v353_v38 = vld [vmem:[%s1720_s0 + $0x14] sm:$0xf] }
  0x2d   : > { %597 = vrot.lane.b32.xlu0 %v1191_v32, %s1373_s15  ;;  %485 = vrot.lane.b32.xlu1 %v1191_v32, %s1374_s16  ;;  %s1377_s16 = smov 112  }
  0x31   : > { %668 = vrot.lane.b32.xlu0 %v1489_v41, %s1368_s28  ;;  %470 = vrot.lane.b32.xlu1 %v1450_v5, %s1375_s17 }
  0x35   : > { %765 = vrot.lane.b32.xlu1 %v1469_v9, %s1375_s17  ;;  %472 = vrot.lane.b32.xlu0 %v1334_v42, %s1375_s17 }
  0x39   : > { %468 = vrot.lane.b32.xlu1 %v1479_v31, %s1375_s17  ;;  %767 = vrot.lane.b32.xlu0 %v1335_v43, %s1375_s17 }
  0x3d   : > { %763 = vrot.lane.b32.xlu0 %v1489_v41, %s1375_s17  ;;  %582 = vrot.lane.b32.xlu1 %v1450_v5, %s1376_s26 }
  0x41   : > { %584 = vrot.lane.b32.xlu0 %v1336_v44, %s1376_s26  ;;  %860 = vrot.lane.b32.xlu1 %v1469_v9, %s1376_s26 }
  0x88   : > { %v342_v45 = vpop.permute.xlu0 %341 }
  0x8a   : > { %v340_v46 = vpop.permute.xlu1 %339 }
  0x8b   : > { %v345_v47 = vsel %vm343_vm1, %v340_v46, %v342_v45 }
  0x8c   : > { %952 = vmatprep.subr.bf16.mxu0 %v345_v47  ;;  %v673_v48 = vpop.permute.xlu0 %672 }
  0x8e   : > { %v671_v49 = vpop.permute.xlu1 %670 }
  0x8f   : > { %v675_v50 = vsel %vm343_vm1, %v671_v49, %v673_v48 }
  0x90   : > { %993 = vmatprep.subr.bf16.mxu1 %v675_v50  ;;  %v1225_v50 = vld [vmem:[%s1720_s0 + $0x20] sm:$0xf] }
  0x97   : > { %v527_v51 = vpop.permute.xlu1 %526  ;;  %v415_v52 = vpop.permute.xlu0 %414 }
  0x98   : > { %v416_v55 = vrot.slane %v415_v52, 4  ;;  %v528_v5 = vrot.slane %v527_v51, 4 }
  0x9a   : > { %v418_v56 = vsel %vm417_vm2, %v416_v55, %v415_v52  ;;  %v422_v57 = vmul.bf16 %v416_v55, %v411_v53  ;;  %v424_v58 = vmul.bf16 %v416_v55, %v413_v54  ;;  %v718_v10 = vmul.bf16 %v1232_v59, %v416_v55  ;;  %v482_v53 = vld [vmem:[%s1720_s0 + $0x8] sm:$0xf]  ;;  %v484_v54 = vld [vmem:[%s1720_s0 + $0x14] sm:$0xf] }
  0x9b   : > { %v338_v60 = vpop.permute.xlu1 %337  ;;  %v374_v61 = vpop.permute.xlu0 %373  ;;  %v421_v63 = vmul.bf16 %v418_v56, %v1440_v2  ;;  %v423_v0 = vmul.bf16 %v418_v56, %v1445_v3  ;;  %v717_v11 = vmul.bf16 %v1458_v7, %v418_v56  ;;  %v719_v12 = vmul.bf16 %v1463_v8, %v418_v56 }
  0x9c   : > { %v344_v6 = vsel %vm343_vm1, %v338_v60, %v340_v46  ;;  %v1197_v9 = vcombine.low %v422_v57, %v424_v58  ;;  %v720_v14 = vmul.bf16 %v1234_v62, %v416_v55  ;;  %v534_v16 = vmul.bf16 %v528_v5, %v523_v1  ;;  %v1246_v1 = vld [vmem:[%s1720_s0 + $0x20] sm:$0xf] }
  0x9d   : > { %953 = vmatpush1.bf16.msra.mxu0 %v344_v6  ;;  %v1196_v13 = vcombine.high %v421_v63, %v423_v0  ;;  %v536_v17 = vmul.bf16 %v528_v5, %v525_v4  ;;  %v1236_v19 = vcombine.high %v717_v11, %v719_v12  ;;  %v530_v22 = vsel %vm529_vm3, %v528_v5, %v527_v51  ;;  %v1227_v51 = vld [vmem:[%s1720_s0 + $0x2c] sm:$0xf] }
  0x9e   : > { %442 = vrot.lane.b32.xlu0 %v1197_v9, %s1377_s16  ;;  %v1237_v18 = vcombine.low %v718_v10, %v720_v14  ;;  %v813_v26 = vmul.bf16 %v1253_v20, %v528_v5  ;;  %v815_v27 = vmul.bf16 %v1255_v21, %v528_v5  ;;  %v533_v28 = vmul.bf16 %v530_v22, %v1440_v2  ;;  %v1248_v4 = vld [vmem:[%s1720_s0 + $0x2c] sm:$0xf] }
  0x9f   : > { %v1538_v15 = vpop.permute.xlu0 %597  ;;  %440 = vrot.lane.b32.xlu1 %v1196_v13, %s1377_s16  ;;  %v1206_v24 = vcombine.low %v534_v16, %v536_v17  ;;  %v535_v29 = vmul.bf16 %v530_v22, %v1445_v3  ;;  %v1195_v30 = vcombine.low %v421_v63, %v423_v0  ;;  %v812_v33 = vmul.bf16 %v1458_v7, %v530_v22  ;;  %v1337_v21 = vld [vmem:[%s1720_s0 + $0x20] ss:$12 sps:$4 sm:$0xff]  }
  0xa0   : > { %v1258_v32 = vcombine.low %v813_v26, %v815_v27  ;;  %v814_v34 = vmul.bf16 %v1463_v8, %v530_v22  ;;  %v375_v36 = vrot.slane %v374_v61, 4  ;;  %v1235_v39 = vcombine.low %v717_v11, %v719_v12  ;;  %v596_v26 = vld [vmem:[%s1720_s0 + $0x14] sm:$0xf] }
  0xa1   : > { %v1205_v35 = vcombine.high %v533_v28, %v535_v29  ;;  %v1204_v48 = vcombine.low %v533_v28, %v535_v29  ;;  %v599_v16 = vrot.slane %v1538_v15, 4  ;;  %v1620_v29 = vld [vmem:[%s1721_s1] sm:$0xff] }
  0xa2   : > { %738 = vrot.lane.b32.xlu0 %v1237_v18, %s1377_s16  ;;  %v1257_v40 = vcombine.high %v812_v33, %v814_v34  ;;  %v377_v42 = vsel %vm376_vm4, %v375_v36, %v374_v61  ;;  %v381_v43 = vmul.bf16 %v375_v36, %v351_v37  ;;  %v383_v44 = vmul.bf16 %v375_v36, %v353_v38 }
  0xa3   : > { %v669_v23 = vpop.permute.xlu0 %668  ;;  %736 = vrot.lane.b32.xlu1 %v1236_v19, %s1377_s16  ;;  %v1256_v45 = vcombine.low %v812_v33, %v814_v34  ;;  %v380_v46 = vmul.bf16 %v377_v42, %v1440_v2  ;;  %v382_v47 = vmul.bf16 %v377_v42, %v1445_v3  ;;  %v685_v56 = vmul.bf16 %v1225_v50, %v375_v36  ;;  %v1267_v33 = vld [vmem:[%s1720_s0 + $0x20] sm:$0xf] }
  0xa4   : > { %v674_v25 = vsel %vm343_vm1, %v669_v23, %v671_v49  ;;  %v486_v49 = vpop.permute.xlu1 %485  ;;  %v1194_v52 = vcombine.low %v381_v43, %v383_v44  ;;  %v687_v57 = vmul.bf16 %v1227_v51, %v375_v36  ;;  %v684_v58 = vmul.bf16 %v1458_v7, %v377_v42 }
  0xa5   : > { %994 = vmatpush1.bf16.msra.mxu1 %v674_v25  ;;  %v487_v55 = vrot.slane %v486_v49, 4  ;;  %v686_v59 = vmul.bf16 %v1463_v8, %v377_v42  ;;  %v1193_v60 = vcombine.high %v380_v46, %v382_v47  ;;  %v1192_v10 = vcombine.low %v380_v46, %v382_v47  ;;  %v594_v25 = vld [vmem:[%s1720_s0 + $0x8] sm:$0xf] }
  0xa6   : > { %554 = vrot.lane.b32.xlu0 %v1206_v24, %s1378_s25  ;;  %v1230_v63 = vcombine.low %v685_v56, %v687_v57  ;;  %v601_v22 = vsel %vm600_vm6, %v599_v16, %v1538_v15  ;;  %v605_v15 = vmul.bf16 %v599_v16, %v594_v25  ;;  %v607_v28 = vmul.bf16 %v599_v16, %v596_v26 }
  0xa7   : > { %438 = vrot.lane.b32.xlu1 %v1195_v30, %s1377_s16  ;;  %v493_v61 = vmul.bf16 %v487_v55, %v482_v53  ;;  %v495_v62 = vmul.bf16 %v487_v55, %v484_v54  ;;  %v1229_v0 = vcombine.high %v684_v58, %v686_v59  ;;  %v780_v6 = vmul.bf16 %v1246_v1, %v487_v55  ;;  %v473_v42 = vpop.permute.xlu0 %472 }
  0xa8   : > { %v782_v9 = vmul.bf16 %v1248_v4, %v487_v55  ;;  %v489_v11 = vsel %vm488_vm5, %v487_v55, %v486_v49  ;;  %v1228_v17 = vcombine.low %v684_v58, %v686_v59  ;;  %v604_v23 = vmul.bf16 %v601_v22, %v1440_v2 }
  0xa9   : > { %v1203_v5 = vcombine.low %v493_v61, %v495_v62  ;;  %v492_v13 = vmul.bf16 %v489_v11, %v1440_v2  ;;  %v494_v14 = vmul.bf16 %v489_v11, %v1445_v3  ;;  %v779_v18 = vmul.bf16 %v1458_v7, %v489_v11 }
  0xaa   : > { %833 = vrot.lane.b32.xlu0 %v1258_v32, %s1378_s25  ;;  %v1251_v12 = vcombine.low %v780_v6, %v782_v9  ;;  %v781_v19 = vmul.bf16 %v1463_v8, %v489_v11  ;;  %v606_v24 = vmul.bf16 %v601_v22, %v1445_v3  ;;  %v874_v30 = vmul.bf16 %v1458_v7, %v601_v22 }
  0xab   : > { %552 = vrot.lane.b32.xlu1 %v1205_v35, %s1378_s25  ;;  %v1202_v20 = vcombine.high %v492_v13, %v494_v14  ;;  %v1201_v27 = vcombine.low %v492_v13, %v494_v14  ;;  %v876_v32 = vmul.bf16 %v1463_v8, %v601_v22  ;;  %v1274_v34 = vcombine.high %v1620_v29, %v1620_v29  ;;  %v768_v44 = vpop.permute.xlu0 %767 }
  0xac   : > { %v1211_v2 = vcombine.high %v604_v23, %v606_v24  ;;  %v1249_v3 = vcombine.low %v779_v18, %v781_v19  ;;  %v1212_v35 = vcombine.low %v605_v15, %v607_v28  ;;  %v875_v7 = vmul.bf16 %v1267_v33, %v599_v16 }
  0xad   : > { %1275 = vmatprep.mubr.msk.bf16.mxu0 %vm417_vm2, %v1274_v34  ;;  %1276 = vmatprep.mubr.msk.bf16.mxu1 %vm417_vm2, %v1274_v34  ;;  %v1271_v36 = vcombine.high %v874_v30, %v876_v32  ;;  %v1210_v38 = vcombine.low %v604_v23, %v606_v24 }
  0xae   : > { %734 = vrot.lane.b32.xlu0 %v1235_v39, %s1377_s16  ;;  %v1270_v39 = vcombine.low %v874_v30, %v876_v32 }
  0xaf   : > { %831 = vrot.lane.b32.xlu1 %v1257_v40, %s1378_s25  ;;  %v471_v40 = vpop.permute.xlu1 %470  ;;  %v764_v47 = vpop.permute.xlu0 %763 }
  0xb2   : > { %829 = vrot.lane.b32.xlu0 %v1256_v45, %s1378_s25 }
  0xb3   : > { %550 = vrot.lane.b32.xlu1 %v1204_v48, %s1378_s25  ;;  %v1635_v43 = vpop.permute.xlu1 %765  ;;  %v1639_v48 = vpop.permute.xlu0 %584 }
  0xb4   : > { %v770_v25 = vsel %vm474_vm9, %v1635_v43, %v768_v44  ;;  %v769_v15 = vsel %vm474_vm9, %v764_v47, %v1635_v43 }
  0xb6   : > { %401 = vrot.lane.b32.xlu0 %v1194_v52, %s1379_s14 }
  0xb7   : > { %399 = vrot.lane.b32.xlu1 %v1193_v60, %s1379_s14  ;;  %v469_v45 = vpop.permute.xlu1 %468 }
  0xba   : > { %705 = vrot.lane.b32.xlu0 %v1230_v63, %s1379_s14 }
  0xbb   : > { %703 = vrot.lane.b32.xlu1 %v1229_v0, %s1379_s14  ;;  %v1637_v46 = vpop.permute.xlu1 %582 }
  0xbe   : > { %513 = vrot.lane.b32.xlu0 %v1203_v5, %s1380_s23 }
  0xbf   : > { %397 = vrot.lane.b32.xlu1 %v1192_v10, %s1379_s14  ;;  %v1641_v49 = vpop.permute.xlu1 %860 }
  0xc2   : > { %800 = vrot.lane.b32.xlu0 %v1251_v12, %s1380_s23 }
  0xc3   : > { %580 = vrot.lane.b32.xlu1 %v1479_v31, %s1376_s26  ;;  %v1250_v31 = vcombine.high %v779_v18, %v781_v19 }
  0xc6   : > { %701 = vrot.lane.b32.xlu0 %v1228_v17, %s1379_s14 }
  0xc7   : > { %511 = vrot.lane.b32.xlu1 %v1202_v20, %s1380_s23  ;;  %v475_v20 = vsel %vm474_vm9, %v469_v45, %v471_v40 }
  0xca   : > { %862 = vrot.lane.b32.xlu0 %v1337_v21, %s1376_s26 }
  0xcb   : > { %798 = vrot.lane.b32.xlu1 %v1250_v31, %s1380_s23 }
  0xce   : > { %858 = vrot.lane.b32.xlu0 %v1489_v41, %s1376_s26  ;;  %v1269_v41 = vld [vmem:[%s1720_s0 + $0x2c] sm:$0xf] }
  0xcf   : > { %509 = vrot.lane.b32.xlu1 %v1201_v27, %s1380_s23  ;;  %v877_v8 = vmul.bf16 %v1269_v41, %v599_v16  ;;  %v476_v16 = vsel %vm474_vm9, %v471_v40, %v473_v42 }
  0xd1   : > { %v1272_v37 = vcombine.low %v875_v7, %v877_v8 }
  0xd2   : > { %796 = vrot.lane.b32.xlu0 %v1249_v3, %s1380_s23 }
  0xd3   : > { %623 = vrot.lane.b32.xlu1 %v1211_v2, %s1381_s11 }
  0xd6   : > { %625 = vrot.lane.b32.xlu0 %v1212_v35, %s1381_s11  ;;  %v588_v35 = vsel %vm586_vm12, %v1637_v46, %v1639_v48 }
  0xd7   : > { %893 = vrot.lane.b32.xlu1 %v1271_v36, %s1381_s11 }
  0xda   : > { %895 = vrot.lane.b32.xlu0 %v1272_v37, %s1381_s11 }
  0xdb   : > { %621 = vrot.lane.b32.xlu1 %v1210_v38, %s1381_s11 }
  0xde   : > { %891 = vrot.lane.b32.xlu0 %v1270_v39, %s1381_s11 }
 0x110   : > { %v443_v50 = vpop.permute.xlu0 %442 }
 0x111   : > { %v441_v51 = vpop.permute.xlu1 %440 }
 0x112   : > { %v446_v11 = vsel %vm444_vm8, %v441_v51, %v443_v50 }
 0x114   : > { %v739_v52 = vpop.permute.xlu0 %738 }
 0x115   : > { %v737_v53 = vpop.permute.xlu1 %736 }
 0x116   : > { %v741_v21 = vsel %vm444_vm8, %v737_v53, %v739_v52 }
 0x118   : > { %v555_v54 = vpop.permute.xlu0 %554 }
 0x119   : > { %v439_v55 = vpop.permute.xlu1 %438 }
 0x11a   : > { %v445_v14 = vsel %vm444_vm8, %v439_v55, %v441_v51 }
 0x11c   : > { %v1643_v56 = vpop.permute.xlu0 %833 }
 0x11d   : > { %v553_v57 = vpop.permute.xlu1 %552 }
 0x11e   : > { %v558_v3 = vsel %vm556_vm11, %v553_v57, %v555_v54 }
 0x120   : > { %v735_v58 = vpop.permute.xlu0 %734 }
 0x121   : > { %v1645_v59 = vpop.permute.xlu1 %831  ;;  %v740_v24 = vsel %vm444_vm8, %v735_v58, %v737_v53 }
 0x122   : > { %v836_v34 = vsel %vm556_vm11, %v1645_v59, %v1643_v56 }
 0x124   : > { %v1647_v60 = vpop.permute.xlu0 %829 }
 0x125   : > { %v551_v61 = vpop.permute.xlu1 %550  ;;  %v835_v36 = vsel %vm556_vm11, %v1647_v60, %v1645_v59 }
 0x126   : > { %v557_v41 = vsel %vm556_vm11, %v551_v61, %v553_v57 }
 0x128   : > { %v402_v62 = vpop.permute.xlu0 %401 }
 0x129   : > { %v400_v63 = vpop.permute.xlu1 %399 }
 0x12a   : > { %v405_v0 = vsel %vm403_vm7, %v400_v63, %v402_v62 }
 0x12b   : > { %954 = vmatprep.subr.bf16.mxu0 %v405_v0 }
 0x12c   : > { %v706_v1 = vpop.permute.xlu0 %705 }
 0x12d   : > { %v704_v4 = vpop.permute.xlu1 %703 }
 0x12e   : > { %v708_v5 = vsel %vm403_vm7, %v704_v4, %v706_v1 }
 0x12f   : > { %995 = vmatprep.subr.bf16.mxu1 %v708_v5 }
 0x130   : > { %v514_v6 = vpop.permute.xlu0 %513 }
 0x131   : > { %v398_v9 = vpop.permute.xlu1 %397 }
 0x132   : > { %v404_v10 = vsel %vm403_vm7, %v398_v9, %v400_v63  ;;  %v1044_v9 = vld [vmem:[#allocation4] sm:$0xff] (!%p1277_p5) }
 0x133   : > { %955 = vmatpush1.bf16.msra.mxu0 %v404_v10 }
 0x134   : > { %v801_v12 = vpop.permute.xlu0 %800  ;;  %956 = vmatprep.subr.bf16.mxu0 %v446_v11 }
 0x135   : > { %v581_v13 = vpop.permute.xlu1 %580 }
 0x136   : > { %v587_v37 = vsel %vm586_vm12, %v581_v13, %v1637_v46  ;;  %v1273_v46 = vcombine.low %v1620_v29, %v1620_v29 }
 0x137   : > { %957 = vmatpush1.bf16.msra.mxu0 %v445_v14 }
 0x138   : > { %v702_v17 = vpop.permute.xlu0 %701  ;;  %958 = vmatprep.subr.bf16.mxu0 %v476_v16 }
 0x139   : > { %v512_v18 = vpop.permute.xlu1 %511  ;;  %v707_v19 = vsel %vm403_vm7, %v702_v17, %v704_v4  ;;  %v1035_v4 = vld [vmem:[#allocation3] sm:$0xff] (!%p1277_p5) }
 0x13a   : > { %996 = vmatpush1.bf16.msra.mxu1 %v707_v19  ;;  %v517_v22 = vsel %vm515_vm10, %v512_v18, %v514_v6 }
 0x13b   : > { %959 = vmatpush1.bf16.msra.mxu0 %v475_v20  ;;  %997 = vmatprep.subr.bf16.mxu1 %v741_v21 }
 0x13c   : > { %v863_v31 = vpop.permute.xlu0 %862  ;;  %960 = vmatprep.subr.bf16.mxu0 %v517_v22 }
 0x13d   : > { %v799_v23 = vpop.permute.xlu1 %798  ;;  %v865_v38 = vsel %vm586_vm12, %v1641_v49, %v863_v31 }
 0x13e   : > { %998 = vmatpush1.bf16.msra.mxu1 %v740_v24  ;;  %v803_v2 = vsel %vm515_vm10, %v799_v23, %v801_v12 }
 0x13f   : > { %999 = vmatprep.subr.bf16.mxu1 %v770_v25 }
 0x140   : > { %v859_v26 = vpop.permute.xlu0 %858 }
 0x141   : > { %v510_v27 = vpop.permute.xlu1 %509  ;;  %v864_v43 = vsel %vm586_vm12, %v859_v26, %v1641_v49 }
 0x142   : > { %1000 = vmatpush1.bf16.msra.mxu1 %v769_v15  ;;  %v516_v28 = vsel %vm515_vm10, %v510_v27, %v512_v18 }
 0x143   : > { %961 = vmatpush1.bf16.msra.mxu0 %v516_v28  ;;  %1001 = vmatprep.subr.bf16.mxu1 %v803_v2 }
 0x144   : > { %v797_v30 = vpop.permute.xlu0 %796  ;;  %962 = vmatprep.subr.bf16.mxu0 %v558_v3 }
 0x145   : > { %v624_v32 = vpop.permute.xlu1 %623  ;;  %v802_v33 = vsel %vm515_vm10, %v797_v30, %v799_v23 }
 0x146   : > { %1002 = vmatpush1.bf16.msra.mxu1 %v802_v33 }
 0x147   : > { %963 = vmatpush1.bf16.msra.mxu0 %v557_v41  ;;  %1003 = vmatprep.subr.bf16.mxu1 %v836_v34 }
 0x148   : > { %v626_v7 = vpop.permute.xlu0 %625  ;;  %964 = vmatprep.subr.bf16.mxu0 %v588_v35 }
 0x149   : > { %v894_v8 = vpop.permute.xlu1 %893  ;;  %v629_v39 = vsel %vm627_vm13, %v624_v32, %v626_v7 }
 0x14a   : > { %1004 = vmatpush1.bf16.msra.mxu1 %v835_v36 }
 0x14b   : > { %965 = vmatpush1.bf16.msra.mxu0 %v587_v37  ;;  %1005 = vmatprep.subr.bf16.mxu1 %v865_v38 }
 0x14c   : > { %v896_v40 = vpop.permute.xlu0 %895  ;;  %966 = vmatprep.subr.bf16.mxu0 %v629_v39 }
 0x14d   : > { %v622_v42 = vpop.permute.xlu1 %621  ;;  %v898_v44 = vsel %vm627_vm13, %v894_v8, %v896_v40 }
 0x14e   : > { %1006 = vmatpush1.bf16.msra.mxu1 %v864_v43  ;;  %v628_v45 = vsel %vm627_vm13, %v622_v42, %v624_v32 }
 0x14f   : > { %967 = vmatpush1.bf16.msra.mxu0 %v628_v45  ;;  %1007 = vmatprep.subr.bf16.mxu1 %v898_v44 }
 0x150   : > { %v892_v47 = vpop.permute.xlu0 %891 }
 0x151   : > { %v897_v48 = vsel %vm627_vm13, %v892_v47, %v894_v8 }
 0x152   : > { %983 = vmatmul.mubr.bf16.vlgmr.msra.gmra.mrb[0].mxu0 %v1273_v46  ;;  %1008 = vmatpush1.bf16.msra.mxu1 %v897_v48 }
 0x155   : > { %1024 = vmatmul.mubr.bf16.vlgmr.msra.gmra.mrb[0].mxu1 %v1273_v46 }
 0x225   : > { %v984_v50 = vpop.f32.mrb[0].mxu0  ;;  %1034 = sbr.rel (%p1277_p5) target bundleno = 706 (0x2c2), region = 48 }
 0x226   : > { %v986_v51 = vpop.f32.mrb[1].mxu0  ;;  %v1045_v57 = vmul.f32 (!%p1277_p5), %v984_v50, %v984_v50 }
 0x227   : > { %v988_v52 = vpop.f32.mrb[2].mxu0  ;;  %v1036_v29 = vadd.f32 (!%p1277_p5), %v986_v51, %v984_v50  ;;  %v1046_v58 = vmul.f32 (!%p1277_p5), %v986_v51, %v986_v51 }
 0x228   : > { %v989_v49 = vpop.f32.mrb[3].mxu0  ;;  %v1025_v53 = vpop.f32.mrb[0].mxu1 }
 0x229   : > { %v1027_v54 = vpop.f32.mrb[1].mxu1  ;;  %v1047_v59 = vmul.f32 (!%p1277_p5), %v1025_v53, %v1025_v53  ;;  %v1037_v60 = vadd.f32 (!%p1277_p5), %v1036_v29, %v1025_v53  ;;  %v1049_v62 = vadd.f32 (!%p1277_p5), %v1046_v58, %v1045_v57 }
 0x22a   : > { %v1029_v55 = vpop.f32.mrb[2].mxu1  ;;  %v1048_v61 = vmul.f32 (!%p1277_p5), %v1027_v54, %v1027_v54 }
 0x22b   : > { %v1030_v56 = vpop.f32.mrb[3].mxu1  ;;  %v1038_v63 = vadd.f32 (!%p1277_p5), %v1037_v60, %v1027_v54  ;;  %v1050_v0 = vadd.f32 (!%p1277_p5), %v1049_v62, %v1047_v59 }
 0x22d   : > { %1039 = vadd.xlane.f32.xlu0 %v1038_v63  ;;  %v1051_v1 = vadd.f32 %v1050_v0, %v1048_v61 }
 0x231   : > { %1052 = vadd.xlane.f32.xlu0 %v1051_v1 }
 0x2ba   : > { %v1040_v5 = vpop.xlane.xlu0 %1039 }
 0x2bb   : > { %v1041_v6 = vadd.f32 %v1040_v5, %v1035_v4 }
 0x2bd   : > { %1043 = vst.msk [vmem:[#allocation3] sm:$0xff] %vm1042_vm14, %v1041_v6 }
 0x2be   : > { %v1053_v10 = vpop.xlane.xlu0 %1052 }
 0x2bf   : > { %v1054_v11 = vadd.f32 %v1053_v10, %v1044_v9 }
 0x2c1   : > { %1055 = vst.msk [vmem:[#allocation4] sm:$0xff] %vm1042_vm14, %v1054_v11 }
 0x2c2 PF: > { %p1056_p6 = scmp.eq.s32.totalorder %s1357_s18, 1 }
 0x2c3   : > { %v1067_v20 = vld [vmem:[%s1722_s2] sm:$0xff] (%p1056_p6)  ;;  %vm1071_vm15 = vcmask (%p1056_p6), 7168  }
 0x2c4   : > { %1060 = sbr.rel (!%p1056_p6) target bundleno = 737 (0x2e1), region = 52  ;;  %v1061_v12 = vld [vmem:[#allocation3] sm:$0xff] (%p1056_p6) }
 0x2c5   : > { %v1062_v14 = vmul.f32 (%p1056_p6), 0.001953125, %v1061_v12  ;;  %v1073_v31 = vld [vmem:[%s1723_s3] sm:$0xff] (%p1056_p6) }
 0x2c7   : > { %v1065_v17 = vmul.f32 (%p1056_p6), %v1062_v14, %v1062_v14 }
 0x2c8   : > { %v1063_v13 = vld [vmem:[#allocation4] sm:$0xff] (%p1056_p6) }
 0x2c9   : > { %v1064_v16 = vmul.f32 (%p1056_p6), 0.001953125, %v1063_v13 }
 0x2cb   : > { %v1066_v18 = vsub.f32 %v1064_v16, %v1065_v17 }
 0x2cd   : > { %v1068_v19 = vadd.f32 1e-05, %v1066_v18 }
 0x2cf   : > { %1340 = vrsqrt.f32 %v1068_v19 }
 0x2d9   : > { %v1341_v21 = vpop.eup %1340 }
 0x2da   : > { %v1070_v22 = vmul.f32 %v1341_v21, %v1067_v20 }
 0x2dc   : > { %1072 = vst.msk [vmem:[#allocation5] sm:$0xff] %vm1071_vm15, %v1070_v22  ;;  %v1074_v23 = vmul.f32 %v1070_v22, %v1062_v14 }
 0x2de   : > { %v1075_v24 = vsub.f32 %v1073_v31, %v1074_v23 }
 0x2e0   : > { %1076 = vst.msk [vmem:[#allocation6] sm:$0xff] %vm1071_vm15, %v1075_v24 }
 0x2e1 PF: > { %p1279_p7 = scmp.ne.s32.totalorder %s1357_s18, 1 }
 0x2e2   : > { %v1382_v26 = vmov (!%p1279_p7), 0  }
 0x2e3   : > { %1079 = sbr.rel (%p1279_p7) target bundleno = 876 (0x36c), region = 56  ;;  %v1080_v25 = vld [vmem:[#allocation5] sm:$0xff] (!%p1279_p7)  ;;  %1342 = vset.pattern.permute.xlu0 (!%p1279_p7), %v1382_v26 }
 0x2e4   : > { %1083 = vperm.xlu0 (!%p1279_p7), %1342, %v1080_v25  }
 0x2e7   : > { %v1090_v27 = vld [vmem:[#allocation6] sm:$0xff] (!%p1279_p7) }
 0x2e8   : > { %1093 = vperm.xlu0 (!%p1279_p7), %1342, %v1090_v27  }
 0x363   : > { %v1084_v15 = vpop.permute.xlu0 %1083 }
 0x364   : > { %v1086_v28 = vmul.f32 %v1084_v15, %v984_v50  ;;  %v1087_v2 = vmul.f32 %v1084_v15, %v986_v51  ;;  %v1088_v3 = vmul.f32 %v1084_v15, %v1025_v53  ;;  %v1089_v30 = vmul.f32 %v1084_v15, %v1027_v54 }
 0x367   : > { %v1094_v32 = vpop.permute.xlu0 %1093 }
 0x368   : > { %v1096_v33 = vadd.f32 %v1094_v32, %v1086_v28  ;;  %v1097_v41 = vadd.f32 %v1094_v32, %v1087_v2  ;;  %v1098_v34 = vadd.f32 %v1094_v32, %v1088_v3  ;;  %v1099_v35 = vadd.f32 %v1094_v32, %v1089_v30 }
 0x36a   : > { %1100 = vst [vmem:[%s1725_s5] sm:$0xff] %v1096_v33  ;;  %1101 = vst [vmem:[%s1725_s5 + $0x8] sm:$0xff] %v1097_v41 }
 0x36b   : > { %1280 = vst [vmem:[%s1725_s5 + $0x10] sm:$0xff] %v1098_v34  ;;  %1281 = vst [vmem:[%s1725_s5 + $0x18] sm:$0xff] %v1099_v35 }
 0x36c PF: > { %s15_s20 = sadd.s32 1, %s1365_s20   ;;  %s1726_s18 = smov %s1361_s19 }
 0x36d   : > { %p12_p8 = scmp.ge.s32.totalorder %s15_s20, 4   ;;  %s1727_s19 = smov %s1729_s21 }
 0x36f   :  { %14 = sbr.rel (!%p12_p8) target bundleno = 2 (0x2), region = 88 }

</bundles_post_ra>
